<compile_context>
chip_gen: v5e
topology: v5e:2x2
jax: 0.10.0
libtpu: 0.0.40
codegen_flags: <defaults>
</compile_context>

<pallas_src>
import numpy as np
import jax
import jax.numpy as jnp
from jax.experimental import pallas as pl
from jax.experimental.pallas import tpu as pltpu

K_BACKBONE_GAIN = float(np.sqrt(2.0))
K_VALUE_NET_GAIN = 1.0
NET_ARCH = [64, 64]
PAD = 128          # lane-dense width for hidden layers and value-head output
DEFAULT_TB = 512   # batch tile (>= 512 hits ~85% of HBM roofline when B is large)


def _round_up(x, m):
    return ((x + m - 1) // m) * m


def _orthogonal(key, shape, gain):
    """Deterministic orthogonal init (matches torch.nn.init.orthogonal_ semantics)."""
    rows, cols = shape
    flat = jax.random.normal(key, (max(rows, cols), min(rows, cols)), dtype=jnp.float32)
    q, r = jnp.linalg.qr(flat)
    q = q * jnp.sign(jnp.diagonal(r))
    if rows < cols:
        q = q.T
    return (gain * q[:rows, :cols]).astype(jnp.float32)


def make_params(state_dim, seed=0):
    """Build lane-padded (in_dim, out_dim)-layout weights and zero biases.

    Real (unpadded) shapes match the PyTorch module; padded rows/cols are zero,
    so the math is bit-identical to the unpadded network.
    """
    key = jax.random.PRNGKey(seed)
    k1, k2, k3 = jax.random.split(key, 3)
    h1, h2 = NET_ARCH

    # PyTorch Linear weight is (out, in); we store its transpose (in, out).
    w1 = _orthogonal(k1, (h1, state_dim), K_BACKBONE_GAIN).T      # (D, 64)
    w2 = _orthogonal(k2, (h2, h1), K_BACKBONE_GAIN).T             # (64, 64)
    w3 = _orthogonal(k3, (1, h2), K_VALUE_NET_GAIN).T             # (64, 1)

    # Zero-pad hidden/output widths to 128 lanes for lane-dense MXU/VPU/vst.
    w1p = jnp.zeros((state_dim, PAD), jnp.float32).at[:, :h1].set(w1)
    w2p = jnp.zeros((PAD, PAD), jnp.float32).at[:h1, :h2].set(w2)
    w3p = jnp.zeros((PAD, PAD), jnp.float32).at[:h2, :1].set(w3)
    b1p = jnp.zeros((1, PAD), jnp.float32)
    b2p = jnp.zeros((1, PAD), jnp.float32)
    b3p = jnp.zeros((1, PAD), jnp.float32)
    return w1p, b1p, w2p, b2p, w3p, b3p


def _mlp_value_kernel(x_ref, w1_ref, b1_ref, w2_ref, b2_ref, w3_ref, b3_ref, v_ref):
    # One batch tile, whole layer stack fused: two tanh MLP layers + value head.
    # All operands are 128-lane dense; dots run on the MXU with f32 accumulate,
    # tanh on the EUP, stores are unmasked vst.
    x = x_ref[...]
    h1 = jnp.tanh(jnp.dot(x, w1_ref[...], preferred_element_type=jnp.float32)
                  + b1_ref[...])
    h2 = jnp.tanh(jnp.dot(h1, w2_ref[...], preferred_element_type=jnp.float32)
                  + b2_ref[...])
    v_ref[...] = (jnp.dot(h2, w3_ref[...], preferred_element_type=jnp.float32)
                  + b3_ref[...])


def mlp_value_forward(states, params, *, block_b=DEFAULT_TB):
    """MLPValueFunction.forward: (B, state_dim) f32 -> (B, 1) f32."""
    w1, b1, w2, b2, w3, b3 = params
    B, D = states.shape
    assert w1.shape[0] == D

    # Batch tile: multiple of 8 sublanes, capped at block_b.
    TB = min(block_b, _round_up(B, 8))
    Bp = _round_up(B, TB)
    if Bp != B:
        states = jnp.pad(states, ((0, Bp - B), (0, 0)))

    grid = (Bp // TB,)
    weight_spec = lambda shape: pl.BlockSpec(shape, lambda i: (0, 0))

    out = pl.pallas_call(
        _mlp_value_kernel,
        out_shape=jax.ShapeDtypeStruct((Bp, PAD), jnp.float32),
        grid=grid,
        in_specs=[
            pl.BlockSpec((TB, D), lambda i: (i, 0)),   # states: tiled over batch
            weight_spec((D, PAD)), weight_spec((1, PAD)),
            weight_spec((PAD, PAD)), weight_spec((1, PAD)),
            weight_spec((PAD, PAD)), weight_spec((1, PAD)),
        ],
        out_specs=pl.BlockSpec((TB, PAD), lambda i: (i, 0)),
        compiler_params=pltpu.CompilerParams(
            dimension_semantics=("parallel",)),        # megacore shard on v7x
    )(states, w1, b1, w2, b2, w3, b3)

    # Only lane 0 carries the value; padded lanes/rows are discarded here.
    return out[:B, :1]


if __name__ == "__main__":
    batch = 8
    state_dim = 16

    key = jax.random.PRNGKey(0)
    states = jax.random.normal(key, (batch, state_dim), dtype=jnp.float32)

    params = make_params(state_dim, seed=0)

    values = mlp_value_forward(states, params)
    jax.block_until_ready(values)
    assert values.shape == (batch, 1)

    # Pure-JAX reference of the same math (padded weights are zero-extended,
    # so this equals the unpadded 16->64->64->1 network).
    w1, b1, w2, b2, w3, b3 = params
    h = jnp.tanh(states @ w1 + b1)
    h = jnp.tanh(h @ w2 + b2)
    ref_values = (h @ w3 + b3)[:, :1]

    assert jnp.allclose(values, ref_values, atol=1e-5, rtol=1e-5)

    print("KERNEL_OK")
</pallas_src>

<mosaic_0001>
module attributes {stable_mosaic.version = 11 : i64} {
  func.func @_mlp_value_kernel(%arg0: i32, %arg1: memref<8x16xf32, #tpu.memory_space<vmem>>, %arg2: memref<16x128xf32, #tpu.memory_space<vmem>>, %arg3: memref<1x128xf32, #tpu.memory_space<vmem>>, %arg4: memref<128x128xf32, #tpu.memory_space<vmem>>, %arg5: memref<1x128xf32, #tpu.memory_space<vmem>>, %arg6: memref<128x128xf32, #tpu.memory_space<vmem>>, %arg7: memref<1x128xf32, #tpu.memory_space<vmem>>, %arg8: memref<8x128xf32, #tpu.memory_space<vmem>>) attributes {dimension_semantics = [#tpu.dimension_semantics<parallel>], iteration_bounds = array<i64: 1>, scalar_prefetch = 0 : i64, scratch_operands = 0 : i64, tpu.core_type = #tpu.core_type<tc>, window_params = [{transform_indices = @transform_0, window_bounds = array<i64: 8, 16>}, {pipeline_mode = #tpu.pipeline_mode<synchronous>, transform_indices = @transform_1, window_bounds = array<i64: 16, 128>}, {pipeline_mode = #tpu.pipeline_mode<synchronous>, transform_indices = @transform_2, window_bounds = array<i64: 1, 128>}, {pipeline_mode = #tpu.pipeline_mode<synchronous>, transform_indices = @transform_3, window_bounds = array<i64: 128, 128>}, {pipeline_mode = #tpu.pipeline_mode<synchronous>, transform_indices = @transform_4, window_bounds = array<i64: 1, 128>}, {pipeline_mode = #tpu.pipeline_mode<synchronous>, transform_indices = @transform_5, window_bounds = array<i64: 128, 128>}, {pipeline_mode = #tpu.pipeline_mode<synchronous>, transform_indices = @transform_6, window_bounds = array<i64: 1, 128>}, {transform_indices = @transform_7, window_bounds = array<i64: 8, 128>}]} {
    %c0 = arith.constant 0 : index
    %c0_0 = arith.constant 0 : index
    %0 = vector.load %arg1[%c0, %c0_0] : memref<8x16xf32, #tpu.memory_space<vmem>>, vector<8x16xf32>
    %c0_1 = arith.constant 0 : index
    %c0_2 = arith.constant 0 : index
    %1 = vector.load %arg2[%c0_1, %c0_2] : memref<16x128xf32, #tpu.memory_space<vmem>>, vector<16x128xf32>
    %cst = arith.constant dense<0.000000e+00> : vector<8x128xf32>
    %2 = tpu.matmul %0, %1, %cst {dimension_numbers = #tpu.dot_dimension_numbers<[1], [0], [0], [1], [0, 0, 1, 1], [], []>} : vector<8x16xf32>, vector<16x128xf32>, vector<8x128xf32> -> vector<8x128xf32>
    %c0_3 = arith.constant 0 : index
    %c0_4 = arith.constant 0 : index
    %3 = vector.load %arg3[%c0_3, %c0_4] : memref<1x128xf32, #tpu.memory_space<vmem>>, vector<1x128xf32>
    %4 = vector.broadcast %3 : vector<1x128xf32> to vector<8x128xf32>
    %5 = arith.addf %2, %4 : vector<8x128xf32>
    %6 = math.tanh %5 : vector<8x128xf32>
    %c0_5 = arith.constant 0 : index
    %c0_6 = arith.constant 0 : index
    %7 = vector.load %arg4[%c0_5, %c0_6] : memref<128x128xf32, #tpu.memory_space<vmem>>, vector<128x128xf32>
    %cst_7 = arith.constant dense<0.000000e+00> : vector<8x128xf32>
    %8 = tpu.matmul %6, %7, %cst_7 {dimension_numbers = #tpu.dot_dimension_numbers<[1], [0], [0], [1], [0, 0, 1, 1], [], []>} : vector<8x128xf32>, vector<128x128xf32>, vector<8x128xf32> -> vector<8x128xf32>
    %c0_8 = arith.constant 0 : index
    %c0_9 = arith.constant 0 : index
    %9 = vector.load %arg5[%c0_8, %c0_9] : memref<1x128xf32, #tpu.memory_space<vmem>>, vector<1x128xf32>
    %10 = vector.broadcast %9 : vector<1x128xf32> to vector<8x128xf32>
    %11 = arith.addf %8, %10 : vector<8x128xf32>
    %12 = math.tanh %11 : vector<8x128xf32>
    %c0_10 = arith.constant 0 : index
    %c0_11 = arith.constant 0 : index
    %13 = vector.load %arg6[%c0_10, %c0_11] : memref<128x128xf32, #tpu.memory_space<vmem>>, vector<128x128xf32>
    %cst_12 = arith.constant dense<0.000000e+00> : vector<8x128xf32>
    %14 = tpu.matmul %12, %13, %cst_12 {dimension_numbers = #tpu.dot_dimension_numbers<[1], [0], [0], [1], [0, 0, 1, 1], [], []>} : vector<8x128xf32>, vector<128x128xf32>, vector<8x128xf32> -> vector<8x128xf32>
    %c0_13 = arith.constant 0 : index
    %c0_14 = arith.constant 0 : index
    %15 = vector.load %arg7[%c0_13, %c0_14] : memref<1x128xf32, #tpu.memory_space<vmem>>, vector<1x128xf32>
    %16 = vector.broadcast %15 : vector<1x128xf32> to vector<8x128xf32>
    %17 = arith.addf %14, %16 : vector<8x128xf32>
    %c0_15 = arith.constant 0 : index
    %c0_16 = arith.constant 0 : index
    %18 = vector.load %arg8[%c0_15, %c0_16] : memref<8x128xf32, #tpu.memory_space<vmem>>, vector<8x128xf32>
    tpu.vector_store %arg8[%c0_15, %c0_16], %17 {strides = array<i32>} : memref<8x128xf32, #tpu.memory_space<vmem>>, vector<8x128xf32>,
    return
  }
  func.func @transform_0(%arg0: i32) -> (i32, i32) {
    %c0_i32 = arith.constant 0 : i32
    %c0_i32_0 = arith.constant 0 : i32
    return %arg0, %c0_i32 : i32, i32
  }
  func.func @transform_1(%arg0: i32) -> (i32, i32) {
    %c0_i32 = arith.constant 0 : i32
    %c0_i32_0 = arith.constant 0 : i32
    %c0_i32_1 = arith.constant 0 : i32
    return %c0_i32, %c0_i32_0 : i32, i32
  }
  func.func @transform_2(%arg0: i32) -> (i32, i32) {
    %c0_i32 = arith.constant 0 : i32
    %c0_i32_0 = arith.constant 0 : i32
    %c0_i32_1 = arith.constant 0 : i32
    return %c0_i32, %c0_i32_0 : i32, i32
  }
  func.func @transform_3(%arg0: i32) -> (i32, i32) {
    %c0_i32 = arith.constant 0 : i32
    %c0_i32_0 = arith.constant 0 : i32
    %c0_i32_1 = arith.constant 0 : i32
    return %c0_i32, %c0_i32_0 : i32, i32
  }
  func.func @transform_4(%arg0: i32) -> (i32, i32) {
    %c0_i32 = arith.constant 0 : i32
    %c0_i32_0 = arith.constant 0 : i32
    %c0_i32_1 = arith.constant 0 : i32
    return %c0_i32, %c0_i32_0 : i32, i32
  }
  func.func @transform_5(%arg0: i32) -> (i32, i32) {
    %c0_i32 = arith.constant 0 : i32
    %c0_i32_0 = arith.constant 0 : i32
    %c0_i32_1 = arith.constant 0 : i32
    return %c0_i32, %c0_i32_0 : i32, i32
  }
  func.func @transform_6(%arg0: i32) -> (i32, i32) {
    %c0_i32 = arith.constant 0 : i32
    %c0_i32_0 = arith.constant 0 : i32
    %c0_i32_1 = arith.constant 0 : i32
    return %c0_i32, %c0_i32_0 : i32, i32
  }
  func.func @transform_7(%arg0: i32) -> (i32, i32) {
    %c0_i32 = arith.constant 0 : i32
    %c0_i32_0 = arith.constant 0 : i32
    return %arg0, %c0_i32 : i32, i32
  }
}

</mosaic_0001>

<bundles_post_ra>
// kernel: tpu_custom_call.1
= control target key start
LH: loop header
LB: loop body
LE: loop exit
PB: predicated region body
PF: predicated region fallthrough
CT: control target
= control target key end

     0   :  { %12 = vsyncpa [#allocation3], 0  ;;  %s435_s0 = inlined_call_operand.hbm [shape: f32[8,16], index: 0, kind: input, shape index: {}]   ;;  %s436_s1 = inlined_call_operand.hbm [shape: f32[16,128], index: 1, kind: input, shape index: {}]   ;;  %s437_s2 = inlined_call_operand.vmem [shape: f32[1,128], index: 2, kind: input, shape index: {}]   ;;  %s438_s3 = inlined_call_operand.hbm [shape: f32[128,128], index: 3, kind: input, shape index: {}]   ;;  %s439_s4 = inlined_call_operand.vmem [shape: f32[1,128], index: 4, kind: input, shape index: {}]   ;;  %s440_s5 = inlined_call_operand.hbm [shape: f32[128,128], index: 5, kind: input, shape index: {}]   ;;  %s441_s6 = inlined_call_operand.vmem [shape: f32[1,128], index: 6, kind: input, shape index: {}]   ;;  %s442_s7 = inlined_call_operand.hbm [shape: f32[8,128], index: 7, kind: output, shape index: {}]  }
   0x1   :  { %13 = vsyncpa [#allocation6], 0 }
   0x2   :  { %14 = vsyncpa [#allocation9], 0  ;;  %s31_s26 = sshll.u32 %s436_s1, 4  ;;  %s32_s26 = int_to_ptr.hbm [resolvable:$true] %s31_s26 }
   0x3   :  { %15 = vsyncpa [#allocation4], 0  ;;  %s364_s27 = smov [#allocation5]   ;;  %s21_s8 = sshll.u32 %s435_s0, 4  ;;  %s22_s8 = int_to_ptr.hbm [resolvable:$true] %s21_s8 }
   0x4   :  { %s33_s28 = sshll.u32 %s364_s27, 4  ;;  %s365_s9 = smov 128   ;;  %s34_s28 = int_to_ptr.vmem [resolvable:$true] %s33_s28 }
   0x5   :  { %s366_s10 = smov 8   ;;  %s367_s11 = smov [#allocation2]  }
   0x6   :  { %39 = dma.hbm_to_vmem [thread:$0]  %s32_s26, 256, %s34_s28, [#allocation6], %s365_s9, %s365_s9, %s366_s10  }
   0x7   :  { %s23_s12 = sshll.u32 %s367_s11, 4  ;;  %s46_s15 = sshll.u32 %s438_s3, 4  ;;  %s24_s12 = int_to_ptr.vmem [resolvable:$true] %s23_s12  ;;  %s47_s15 = int_to_ptr.hbm [resolvable:$true] %s46_s15 }
   0x8   :  { %26 = dma.hbm_to_vmem [thread:$0]  %s22_s8, 128, %s24_s12, [#allocation3]  }
   0x9   :  { %s61_s17 = sshll.u32 %s440_s5, 4  ;;  %s368_s18 = smov [#allocation7]   ;;  %s62_s17 = int_to_ptr.hbm [resolvable:$true] %s61_s17 }
   0xa   :  { %s48_s19 = sshll.u32 %s368_s18, 4  ;;  %s369_s0 = smov [#allocation8]   ;;  %s49_s19 = int_to_ptr.vmem [resolvable:$true] %s48_s19 }
   0xb   :  { %54 = dma.hbm_to_vmem [thread:$0]  %s47_s15, 2048, %s49_s19, [#allocation6], %s365_s9, %s365_s9, %s366_s10  }
   0xc   :  { %s63_s20 = sshll.u32 %s369_s0, 4  ;;  %s64_s20 = int_to_ptr.vmem [resolvable:$true] %s63_s20 }
   0xd   :  { %69 = dma.hbm_to_vmem [thread:$0]  %s62_s17, 2048, %s64_s20, [#allocation9], %s365_s9, %s365_s9, %s366_s10  }
   0xe   :  { %356 = dma.done.wait [#allocation3], 128  }
   0xf   :  { %357 = vsyncadd [#allocation3], 4294967168 }
  0x10   :  { %358 = dma.done.wait [#allocation6], 2304  }
  0x11   :  { %359 = vsyncadd [#allocation6], 4294964992 }
  0x12   :  { %360 = dma.done.wait [#allocation9], 2048  }
  0x13   :  { %361 = vsyncadd [#allocation9], 4294965248  ;;  %v90_v0 = vld [vmem:[#allocation5 + $0x8] sm:$0xff]  ;;  %v89_v1 = vld [vmem:[#allocation5] sm:$0xff]  ;;  %vm95_vm0 = vcmask 130048   ;;  %s370_s24 = smov [#allocation10]  }
  0x14   :  { %113 = vmatpush.msra.mxu0 %v90_v0  ;;  %v88_v2 = vld [vmem:[#allocation2] sm:$0xff]  ;;  %v135_v3 = vld [vmem:[#allocation7 + $0x78] sm:$0xff]  ;;  %v134_v4 = vld [vmem:[#allocation7 + $0x70] sm:$0xff]  ;;  %s207_s25 = sshll.u32 %s370_s24, 4  ;;  %s209_s28 = sshll.u32 %s442_s7, 4  ;;  %s208_s25 = int_to_ptr.vmem [resolvable:$true] %s207_s25  ;;  %s210_s28 = int_to_ptr.hbm [resolvable:$true] %s209_s28 }
  0x15   :  { %140 = vmatpush.msra.mxu1 %v135_v3  ;;  %v133_v5 = vld [vmem:[#allocation7 + $0x68] sm:$0xff]  ;;  %v132_v6 = vld [vmem:[#allocation7 + $0x60] sm:$0xff]  ;;  %v131_v7 = vld [vmem:[#allocation7 + $0x58] sm:$0xff] }
  0x16   :  { %114 = vmatpush.msra.mxu0 %v89_v1  ;;  %v130_v8 = vld [vmem:[#allocation7 + $0x50] sm:$0xff]  ;;  %v129_v9 = vld [vmem:[#allocation7 + $0x48] sm:$0xff]  ;;  %v128_v10 = vld [vmem:[#allocation7 + $0x40] sm:$0xff] }
  0x17   :  { %221 = vmatmul.msk.f32.vlgmr.msra.gmra.mxu0 %vm95_vm0, %v88_v2  ;;  %141 = vmatpush.msra.mxu1 %v134_v4  ;;  %v127_v11 = vld [vmem:[#allocation7 + $0x38] sm:$0xff]  ;;  %v126_v12 = vld [vmem:[#allocation7 + $0x30] sm:$0xff]  ;;  %v125_v13 = vld [vmem:[#allocation7 + $0x28] sm:$0xff] }
  0x18   :  { %v124_v14 = vld [vmem:[#allocation7 + $0x20] sm:$0xff]  ;;  %v123_v15 = vld [vmem:[#allocation7 + $0x18] sm:$0xff]  ;;  %v122_v16 = vld [vmem:[#allocation7 + $0x10] sm:$0xff] }
  0x19   :  { %142 = vmatpush.msra.mxu1 %v133_v5  ;;  %v121_v17 = vld [vmem:[#allocation7 + $0x8] sm:$0xff]  ;;  %v120_v18 = vld [vmem:[#allocation7] sm:$0xff]  ;;  %v176_v19 = vld [vmem:[#allocation8 + $0x78] sm:$0xff] }
  0x1a   :  { %v175_v20 = vld [vmem:[#allocation8 + $0x70] sm:$0xff]  ;;  %181 = vmatpush.msra.mxu2 %v176_v19  ;;  %v174_v21 = vld [vmem:[#allocation8 + $0x68] sm:$0xff]  ;;  %v173_v22 = vld [vmem:[#allocation8 + $0x60] sm:$0xff] }
  0x1b   :  { %143 = vmatpush.msra.mxu1 %v132_v6  ;;  %v172_v23 = vld [vmem:[#allocation8 + $0x58] sm:$0xff]  ;;  %v171_v24 = vld [vmem:[#allocation8 + $0x50] sm:$0xff]  ;;  %v170_v25 = vld [vmem:[#allocation8 + $0x48] sm:$0xff] }
  0x1c   :  { %182 = vmatpush.msra.mxu2 %v175_v20  ;;  %v169_v26 = vld [vmem:[#allocation8 + $0x40] sm:$0xff]  ;;  %v168_v27 = vld [vmem:[#allocation8 + $0x38] sm:$0xff]  ;;  %v167_v28 = vld [vmem:[#allocation8 + $0x30] sm:$0xff] }
  0x1d   :  { %144 = vmatpush.msra.mxu1 %v131_v7  ;;  %v166_v29 = vld [vmem:[#allocation8 + $0x28] sm:$0xff]  ;;  %v165_v34 = vld [vmem:[#allocation8 + $0x20] sm:$0xff]  ;;  %v164_v35 = vld [vmem:[#allocation8 + $0x18] sm:$0xff] }
  0x1e   :  { %183 = vmatpush.msra.mxu2 %v174_v21  ;;  %v229_v30 = vld [vmem:[%s437_s2] ss:$0 sm:$0xff]  ;;  %v163_v36 = vld [vmem:[#allocation8 + $0x10] sm:$0xff]  ;;  %v161_v38 = vld [vmem:[#allocation8] sm:$0xff] }
  0x1f   :  { %145 = vmatpush.msra.mxu1 %v130_v8  ;;  %v162_v37 = vld [vmem:[#allocation8 + $0x8] sm:$0xff] }
  0x20   :  { %184 = vmatpush.msra.mxu2 %v173_v22  ;;  %v230_v39 = vld [vmem:[%s439_s4] ss:$0 sm:$0xff] }
  0x21   :  { %146 = vmatpush.msra.mxu1 %v129_v9  ;;  %v231_v43 = vld [vmem:[%s441_s6] ss:$0 sm:$0xff] }
  0x22   :  { %185 = vmatpush.msra.mxu2 %v172_v23 }
  0x23   :  { %147 = vmatpush.msra.mxu1 %v128_v10 }
  0x24   :  { %186 = vmatpush.msra.mxu2 %v171_v24 }
  0x25   :  { %148 = vmatpush.msra.mxu1 %v127_v11 }
  0x26   :  { %187 = vmatpush.msra.mxu2 %v170_v25 }
  0x27   :  { %149 = vmatpush.msra.mxu1 %v126_v12 }
  0x28   :  { %188 = vmatpush.msra.mxu2 %v169_v26 }
  0x29   :  { %150 = vmatpush.msra.mxu1 %v125_v13 }
  0x2a   :  { %189 = vmatpush.msra.mxu2 %v168_v27 }
  0x2b   :  { %151 = vmatpush.msra.mxu1 %v124_v14 }
  0x2c   :  { %190 = vmatpush.msra.mxu2 %v167_v28 }
  0x2d   :  { %152 = vmatpush.msra.mxu1 %v123_v15 }
  0x2e   :  { %191 = vmatpush.msra.mxu2 %v166_v29 }
  0x2f   :  { %153 = vmatpush.msra.mxu1 %v122_v16 }
  0x30   :  { %192 = vmatpush.msra.mxu2 %v165_v34 }
  0x31   :  { %154 = vmatpush.msra.mxu1 %v121_v17 }
  0x32   :  { %193 = vmatpush.msra.mxu2 %v164_v35 }
  0x33   :  { %155 = vmatpush.msra.mxu1 %v120_v18 }
  0x34   :  { %194 = vmatpush.msra.mxu2 %v163_v36 }
  0x36   :  { %195 = vmatpush.msra.mxu2 %v162_v37 }
  0x38   :  { %196 = vmatpush.msra.mxu2 %v161_v38 }
  0x94   :  { %v116_v31 = vpop.f32.mrf.mxu0 }
  0x95   :  { %v117_v32 = vadd.f32 %v229_v30, %v116_v31 }
  0x97   :  { %232 = vtanh.f32 %v117_v32 }
  0x9d   :  { %v233_v33 = vpop.eup %232 }
  0x9e   :  { %156 = vmatmul.f32.vlgmr.msra.gmra.mxu1 %v233_v33 }
 0x11b   :  { %v157_v40 = vpop.f32.mrf.mxu1 }
 0x11c   :  { %v158_v41 = vadd.f32 %v230_v39, %v157_v40 }
 0x11e   :  { %234 = vtanh.f32 %v158_v41 }
 0x124   :  { %v235_v42 = vpop.eup %234 }
 0x125   :  { %197 = vmatmul.f32.vlgmr.msra.gmra.mxu2 %v235_v42 }
 0x1a8   :  { %v198_v44 = vpop.f32.mrf.mxu2 }
 0x1a9   :  { %v199_v45 = vadd.f32 %v231_v43, %v198_v44 }
 0x1ab   :  { %201 = vst [vmem:[#allocation10] sm:$0xff] %v199_v45 }
 0x1ac   :  { %212 = dma.vmem_to_hbm [thread:$0]  %s208_s25, 128, %s210_s28, [#allocation4]  }
 0x1ad   :  { %362 = dma.done.wait [#allocation4], 128  }
 0x1ae   :  { %363 = vsyncadd [#allocation4], 4294967168 }
 0x1af   :  { %217 = vsyncpa [#allocation3], 1 }
 0x1b0   :  { %218 = vsyncpa [#allocation6], 1 }
 0x1b1   :  { %219 = vsyncpa [#allocation9], 1 }
 0x1b2   :  { %220 = vsyncpa [#allocation4], 1 }

</bundles_post_ra>
